<compile_context>
chip_gen: v7x
topology: tpu7x:2x2x1
jax: 0.10.0
libtpu: 0.0.40
codegen_flags: <defaults>
</compile_context>

<pallas_src>
import jax
import jax.numpy as jnp
from jax.experimental import pallas as pl
from jax.experimental.pallas import tpu as pltpu


LANE = 128          # lane (last-dim) alignment for hidden / output feature dims
MAX_TILE_B = 256    # batch rows per grid step at large B (fills the 256-deep MXU)


def _round_up(n, m):
    return ((n + m - 1) // m) * m


def _pad2(a, rows, cols):
    """Zero-pad a 2-D array up to (rows, cols)."""
    return jnp.pad(a, ((0, rows - a.shape[0]), (0, cols - a.shape[1])))


# ----------------------------------------------------------------------------- kernel


def fc_kernel(x_ref, w1_ref, b1_ref, w2_ref, b2_ref, w3_ref, b3_ref, o_ref):
    # dtype of the MXU operands (bf16 fast path or f32); accumulation is always f32.
    dot_dt = w1_ref.dtype

    # In-kernel cast of the streamed activation tile (keeps the wrapper copy-free).
    x = x_ref[...].astype(dot_dt)

    # linear1 + ReLU  (dropout1 = identity in eval mode)
    h1 = jnp.dot(x, w1_ref[...], preferred_element_type=jnp.float32) + b1_ref[...]
    h1 = jnp.maximum(h1, 0.0)

    # linear2 + ReLU  (dropout2 = identity in eval mode)
    h2 = jnp.dot(h1.astype(dot_dt), w2_ref[...],
                 preferred_element_type=jnp.float32) + b2_ref[...]
    h2 = jnp.maximum(h2, 0.0)

    # linear3 + sigmoid (exact; exp dominates the EUP cost anyway)
    logits = jnp.dot(h2.astype(dot_dt), w3_ref[...],
                     preferred_element_type=jnp.float32) + b3_ref[...]
    o_ref[...] = (1.0 / (1.0 + jnp.exp(-logits))).astype(o_ref.dtype)


# ----------------------------------------------------------------------------- wrapper


def prepare_params(params, *, use_bf16=True):
    """Pad hidden/output feature dims to 128 lanes and cast weights ONCE (init-time).

    Zero padding keeps the math exact: padded hidden columns get zero weights + zero
    bias -> relu(0) = 0, which then hits zero rows of the next (padded) weight matrix.
    params: dict with W as [in, out] (f32) and b as [1, out] (f32).
    """
    dot_dt = jnp.bfloat16 if use_bf16 else jnp.float32
    w1, b1 = params["w1"], params["b1"]
    w2, b2 = params["w2"], params["b2"]
    w3, b3 = params["w3"], params["b3"]

    E, H = w1.shape
    Hh = w2.shape[1]
    C = w3.shape[1]
    H_p, Hh_p, C_p = (_round_up(d, LANE) for d in (H, Hh, C))

    return {
        "w1": _pad2(w1, E, H_p).astype(dot_dt),
        "b1": _pad2(b1, 1, H_p).astype(jnp.float32),
        "w2": _pad2(w2, H_p, Hh_p).astype(dot_dt),
        "b2": _pad2(b2, 1, Hh_p).astype(jnp.float32),
        "w3": _pad2(w3, Hh_p, C_p).astype(dot_dt),
        "b3": _pad2(b3, 1, C_p).astype(jnp.float32),
        "num_category": C,
    }


def _vmem_limit_bytes(E, H_p, Hh_p, C_p, tile_b, dot_elt):
    resident = ((E * H_p + H_p * Hh_p + Hh_p * C_p) * dot_elt        # single-buffered W
                + (H_p + Hh_p + C_p) * 4)                            # single-buffered b
    streamed = 2 * tile_b * E * 4 + 2 * tile_b * C_p * 4             # double-buffered x / out
    temps = 2 * tile_b * (H_p + Hh_p + C_p) * 4                      # h1/h2/logits headroom
    need = resident + streamed + temps
    # ~2x headroom for compiler scratch; never below a sane floor, never above v7x's 64 MiB.
    return int(min(max(2 * need + (4 << 20), 16 << 20), 64 << 20))


def fc_forward(x, prepared, *, tile_b=None):
    """x: [B, embed_dim] float32; prepared: output of prepare_params()."""
    w1, b1 = prepared["w1"], prepared["b1"]
    w2, b2 = prepared["w2"], prepared["b2"]
    w3, b3 = prepared["w3"], prepared["b3"]
    C = prepared["num_category"]

    B, E = x.shape
    H_p = w1.shape[1]
    Hh_p = w2.shape[1]
    C_p = w3.shape[1]

    if tile_b is None:
        # Small B: one tile of exactly B rows (no batch padding at all).
        # Large B: 256-row slabs -> full 256-deep MXU and a >=2-step grid so the
        # "parallel" batch axis can shard across both v7x TensorCores.
        tile_b = B if B <= MAX_TILE_B else MAX_TILE_B
    num_steps = pl.cdiv(B, tile_b)

    dot_elt = jnp.dtype(w1.dtype).itemsize

    cost = pl.CostEstimate(
        flops=2 * B * (E * H_p + H_p * Hh_p + Hh_p * C_p),
        transcendentals=B * C_p,  # exp in the sigmoid
        bytes_accessed=(B * E * 4                                       # x (f32 in HBM)
                        + (E * H_p + H_p * Hh_p + Hh_p * C_p) * dot_elt # weights
                        + (H_p + Hh_p + C_p) * 4                        # biases
                        + B * C_p * 4),                                 # output
    )

    # Grid-invariant operands: constant index_map + single pipeline buffer.
    def resident(shape):
        return pl.BlockSpec(shape, lambda i: (0, 0), pipeline_mode=pl.Buffered(1))

    out_padded = pl.pallas_call(
        fc_kernel,
        out_shape=jax.ShapeDtypeStruct((B, C_p), jnp.float32),
        grid=(num_steps,),
        in_specs=[
            # Streamed activation tile (double-buffered by default).
            pl.BlockSpec((tile_b, E), lambda i: (i, 0)),
            # Weights / biases: resident, single-buffered.
            resident((E, H_p)),
            resident((1, H_p)),
            resident((H_p, Hh_p)),
            resident((1, Hh_p)),
            resident((Hh_p, C_p)),
            resident((1, C_p)),
        ],
        out_specs=pl.BlockSpec((tile_b, C_p), lambda i: (i, 0)),
        compiler_params=pltpu.CompilerParams(
            # Batch grid axis is independent -> shard across TCs on v7x.
            dimension_semantics=("parallel",),
            vmem_limit_bytes=_vmem_limit_bytes(E, H_p, Hh_p, C_p, tile_b, dot_elt),
        ),
        cost_estimate=cost,
    )(x, w1, b1, w2, b2, w3, b3)

    # Slice off the lane padding of the class dimension.
    return out_padded[:, :C]


# ----------------------------------------------------------------------------- init / demo


def init_params(key, embed_dim, hidden_dim, num_category):
    """Deterministic synthetic init (uniform, roughly matching nn.Linear scale)."""
    half = int(0.5 * hidden_dim)
    ks = jax.random.split(key, 6)

    def lin(kw, kb, fan_in, fan_out):
        bound = 1.0 / (fan_in ** 0.5)
        w = jax.random.uniform(kw, (fan_in, fan_out), jnp.float32, -bound, bound)
        b = jax.random.uniform(kb, (1, fan_out), jnp.float32, -bound, bound)
        return w, b

    w1, b1 = lin(ks[0], ks[1], embed_dim, hidden_dim)
    w2, b2 = lin(ks[2], ks[3], hidden_dim, half)
    w3, b3 = lin(ks[4], ks[5], half, num_category)
    return {"w1": w1, "b1": b1, "w2": w2, "b2": b2, "w3": w3, "b3": b3}


if __name__ == "__main__":
    # Small shapes implied by the module: batch=8, embed_dim=32, hidden_dim=32,
    # num_category=8 (hidden//2 = 16 for the middle layer).
    B, embed_dim, hidden_dim, num_category = 8, 32, 32, 8

    key = jax.random.PRNGKey(0)
    k_x, k_p = jax.random.split(key)
    x = jax.random.normal(k_x, (B, embed_dim), jnp.float32)
    params = init_params(k_p, embed_dim, hidden_dim, num_category)

    # Reference in plain JAX (eval-mode dropout = identity).
    h1 = jnp.maximum(x @ params["w1"] + params["b1"], 0.0)
    h2 = jnp.maximum(h1 @ params["w2"] + params["b2"], 0.0)
    ref = jax.nn.sigmoid(h2 @ params["w3"] + params["b3"])

    # f32 MXU path: tight accuracy check.
    prep_f32 = prepare_params(params, use_bf16=False)
    out_f32 = jax.block_until_ready(fc_forward(x, prep_f32))
    assert out_f32.shape == (B, num_category)
    assert jnp.allclose(out_f32, ref, atol=2e-3, rtol=2e-3), (
        float(jnp.max(jnp.abs(out_f32 - ref))))

    # Default bf16-operand MXU path (v6e/v7x fast path): looser tolerance
    # (bf16 inputs only; accumulation and elementwise stay f32).
    prep_bf16 = prepare_params(params)  # use_bf16=True by default
    out_bf16 = jax.block_until_ready(fc_forward(x, prep_bf16))
    assert out_bf16.shape == (B, num_category)
    assert jnp.allclose(out_bf16, ref, atol=2e-2, rtol=2e-2), (
        float(jnp.max(jnp.abs(out_bf16 - ref))))

    print("KERNEL_OK")
</pallas_src>

<mosaic_0001>
module attributes {stable_mosaic.version = 11 : i64} {
  func.func @fc_kernel(%arg0: i32, %arg1: memref<8x32xf32, #tpu.memory_space<vmem>>, %arg2: memref<32x128xf32, #tpu.memory_space<vmem>>, %arg3: memref<1x128xf32, #tpu.memory_space<vmem>>, %arg4: memref<128x128xf32, #tpu.memory_space<vmem>>, %arg5: memref<1x128xf32, #tpu.memory_space<vmem>>, %arg6: memref<128x128xf32, #tpu.memory_space<vmem>>, %arg7: memref<1x128xf32, #tpu.memory_space<vmem>>, %arg8: memref<8x128xf32, #tpu.memory_space<vmem>>) attributes {dimension_semantics = [#tpu.dimension_semantics<parallel>], iteration_bounds = array<i64: 1>, scalar_prefetch = 0 : i64, scratch_operands = 0 : i64, tpu.core_type = #tpu.core_type<tc>, window_params = [{transform_indices = @transform_0, window_bounds = array<i64: 8, 32>}, {pipeline_mode = #tpu.pipeline_mode<synchronous>, transform_indices = @transform_1, window_bounds = array<i64: 32, 128>}, {pipeline_mode = #tpu.pipeline_mode<synchronous>, transform_indices = @transform_2, window_bounds = array<i64: 1, 128>}, {pipeline_mode = #tpu.pipeline_mode<synchronous>, transform_indices = @transform_3, window_bounds = array<i64: 128, 128>}, {pipeline_mode = #tpu.pipeline_mode<synchronous>, transform_indices = @transform_4, window_bounds = array<i64: 1, 128>}, {pipeline_mode = #tpu.pipeline_mode<synchronous>, transform_indices = @transform_5, window_bounds = array<i64: 128, 128>}, {pipeline_mode = #tpu.pipeline_mode<synchronous>, transform_indices = @transform_6, window_bounds = array<i64: 1, 128>}, {transform_indices = @transform_7, window_bounds = array<i64: 8, 128>}]} {
    %c0 = arith.constant 0 : index
    %c0_0 = arith.constant 0 : index
    %0 = vector.load %arg1[%c0, %c0_0] : memref<8x32xf32, #tpu.memory_space<vmem>>, vector<8x32xf32>
    %c0_1 = arith.constant 0 : index
    %c0_2 = arith.constant 0 : index
    %1 = vector.load %arg2[%c0_1, %c0_2] : memref<32x128xf32, #tpu.memory_space<vmem>>, vector<32x128xf32>
    %cst = arith.constant dense<0.000000e+00> : vector<8x128xf32>
    %2 = tpu.matmul %0, %1, %cst {dimension_numbers = #tpu.dot_dimension_numbers<[1], [0], [0], [1], [0, 0, 1, 1], [], []>} : vector<8x32xf32>, vector<32x128xf32>, vector<8x128xf32> -> vector<8x128xf32>
    %c0_3 = arith.constant 0 : index
    %c0_4 = arith.constant 0 : index
    %3 = vector.load %arg3[%c0_3, %c0_4] : memref<1x128xf32, #tpu.memory_space<vmem>>, vector<1x128xf32>
    %4 = vector.broadcast %3 : vector<1x128xf32> to vector<8x128xf32>
    %5 = arith.addf %2, %4 : vector<8x128xf32>
    %cst_5 = arith.constant 0.000000e+00 : f32
    %6 = vector.broadcast %cst_5 : f32 to vector<8x128xf32>
    %7 = arith.maximumf %5, %6 : vector<8x128xf32>
    %c0_6 = arith.constant 0 : index
    %c0_7 = arith.constant 0 : index
    %8 = vector.load %arg4[%c0_6, %c0_7] : memref<128x128xf32, #tpu.memory_space<vmem>>, vector<128x128xf32>
    %cst_8 = arith.constant dense<0.000000e+00> : vector<8x128xf32>
    %9 = tpu.matmul %7, %8, %cst_8 {dimension_numbers = #tpu.dot_dimension_numbers<[1], [0], [0], [1], [0, 0, 1, 1], [], []>} : vector<8x128xf32>, vector<128x128xf32>, vector<8x128xf32> -> vector<8x128xf32>
    %c0_9 = arith.constant 0 : index
    %c0_10 = arith.constant 0 : index
    %10 = vector.load %arg5[%c0_9, %c0_10] : memref<1x128xf32, #tpu.memory_space<vmem>>, vector<1x128xf32>
    %11 = vector.broadcast %10 : vector<1x128xf32> to vector<8x128xf32>
    %12 = arith.addf %9, %11 : vector<8x128xf32>
    %cst_11 = arith.constant 0.000000e+00 : f32
    %13 = vector.broadcast %cst_11 : f32 to vector<8x128xf32>
    %14 = arith.maximumf %12, %13 : vector<8x128xf32>
    %c0_12 = arith.constant 0 : index
    %c0_13 = arith.constant 0 : index
    %15 = vector.load %arg6[%c0_12, %c0_13] : memref<128x128xf32, #tpu.memory_space<vmem>>, vector<128x128xf32>
    %cst_14 = arith.constant dense<0.000000e+00> : vector<8x128xf32>
    %16 = tpu.matmul %14, %15, %cst_14 {dimension_numbers = #tpu.dot_dimension_numbers<[1], [0], [0], [1], [0, 0, 1, 1], [], []>} : vector<8x128xf32>, vector<128x128xf32>, vector<8x128xf32> -> vector<8x128xf32>
    %c0_15 = arith.constant 0 : index
    %c0_16 = arith.constant 0 : index
    %17 = vector.load %arg7[%c0_15, %c0_16] : memref<1x128xf32, #tpu.memory_space<vmem>>, vector<1x128xf32>
    %18 = vector.broadcast %17 : vector<1x128xf32> to vector<8x128xf32>
    %19 = arith.addf %16, %18 : vector<8x128xf32>
    %cst_17 = arith.constant 0.000000e+00 : f32
    %20 = vector.broadcast %cst_17 : f32 to vector<8x128xf32>
    %21 = arith.subf %20, %19 : vector<8x128xf32>
    %22 = math.exp %21 : vector<8x128xf32>
    %cst_18 = arith.constant 1.000000e+00 : f32
    %23 = vector.broadcast %cst_18 : f32 to vector<8x128xf32>
    %24 = arith.addf %23, %22 : vector<8x128xf32>
    %cst_19 = arith.constant 1.000000e+00 : f32
    %25 = vector.broadcast %cst_19 : f32 to vector<8x128xf32>
    %26 = arith.divf %25, %24 : vector<8x128xf32>
    %c0_20 = arith.constant 0 : index
    %c0_21 = arith.constant 0 : index
    %27 = vector.load %arg8[%c0_20, %c0_21] : memref<8x128xf32, #tpu.memory_space<vmem>>, vector<8x128xf32>
    tpu.vector_store %arg8[%c0_20, %c0_21], %26 {strides = array<i32>} : memref<8x128xf32, #tpu.memory_space<vmem>>, vector<8x128xf32>,
    return
  }
  func.func @transform_0(%arg0: i32) -> (i32, i32) {
    %c0_i32 = arith.constant 0 : i32
    %c0_i32_0 = arith.constant 0 : i32
    return %arg0, %c0_i32 : i32, i32
  }
  func.func @transform_1(%arg0: i32) -> (i32, i32) {
    %c0_i32 = arith.constant 0 : i32
    %c0_i32_0 = arith.constant 0 : i32
    %c0_i32_1 = arith.constant 0 : i32
    return %c0_i32, %c0_i32_0 : i32, i32
  }
  func.func @transform_2(%arg0: i32) -> (i32, i32) {
    %c0_i32 = arith.constant 0 : i32
    %c0_i32_0 = arith.constant 0 : i32
    %c0_i32_1 = arith.constant 0 : i32
    return %c0_i32, %c0_i32_0 : i32, i32
  }
  func.func @transform_3(%arg0: i32) -> (i32, i32) {
    %c0_i32 = arith.constant 0 : i32
    %c0_i32_0 = arith.constant 0 : i32
    %c0_i32_1 = arith.constant 0 : i32
    return %c0_i32, %c0_i32_0 : i32, i32
  }
  func.func @transform_4(%arg0: i32) -> (i32, i32) {
    %c0_i32 = arith.constant 0 : i32
    %c0_i32_0 = arith.constant 0 : i32
    %c0_i32_1 = arith.constant 0 : i32
    return %c0_i32, %c0_i32_0 : i32, i32
  }
  func.func @transform_5(%arg0: i32) -> (i32, i32) {
    %c0_i32 = arith.constant 0 : i32
    %c0_i32_0 = arith.constant 0 : i32
    %c0_i32_1 = arith.constant 0 : i32
    return %c0_i32, %c0_i32_0 : i32, i32
  }
  func.func @transform_6(%arg0: i32) -> (i32, i32) {
    %c0_i32 = arith.constant 0 : i32
    %c0_i32_0 = arith.constant 0 : i32
    %c0_i32_1 = arith.constant 0 : i32
    return %c0_i32, %c0_i32_0 : i32, i32
  }
  func.func @transform_7(%arg0: i32) -> (i32, i32) {
    %c0_i32 = arith.constant 0 : i32
    %c0_i32_0 = arith.constant 0 : i32
    return %arg0, %c0_i32 : i32, i32
  }
}

</mosaic_0001>

<bundles_post_ra>
// kernel: tpu_custom_call.1
= control target key start
LH: loop header
LB: loop body
LE: loop exit
PB: predicated region body
PF: predicated region fallthrough
CT: control target
= control target key end

     0   :  { %12 = vsyncpa [#allocation3], 0  ;;  %s837_s0 = inlined_call_operand.hbm [shape: f32[8,32], index: 0, kind: input, shape index: {}]   ;;  %s838_s1 = inlined_call_operand.hbm [shape: f32[32,128], index: 1, kind: input, shape index: {}]   ;;  %s839_s2 = inlined_call_operand.vmem [shape: f32[1,128], index: 2, kind: input, shape index: {}]   ;;  %s840_s3 = inlined_call_operand.hbm [shape: f32[128,128], index: 3, kind: input, shape index: {}]   ;;  %s841_s4 = inlined_call_operand.vmem [shape: f32[1,128], index: 4, kind: input, shape index: {}]   ;;  %s842_s5 = inlined_call_operand.hbm [shape: f32[128,128], index: 5, kind: input, shape index: {}]   ;;  %s843_s6 = inlined_call_operand.vmem [shape: f32[1,128], index: 6, kind: input, shape index: {}]   ;;  %s844_s7 = inlined_call_operand.hbm [shape: f32[8,128], index: 7, kind: output, shape index: {}]  }
   0x1   :  { %13 = vsyncpa [#allocation6], 0 }
   0x2   :  { %14 = vsyncpa [#allocation9], 0 }
   0x3   :  { %15 = vsyncpa [#allocation4], 0  ;;  %s688_s24 = smov [#allocation5]   ;;  %s570_s28 = scalar_lea.hbm %s838_s1, 512 }
   0x4   :  { %s31_s25 = sshll.u32 %s688_s24, 4  ;;  %p571_p0 = scmp.ne.s32.totalorder %s838_s1, %s570_s28  ;;  %s32_s25 = int_to_ptr.vmem [resolvable:$true] %s31_s25 }
   0x5   :  { %p574_p1 = scmp.lt.u32.totalorder %s570_s28, %s838_s1 }
   0x7   :  { %p576_p2 = pnand %p574_p1, %p571_p0 }
   0x9   :  { %579 = shalt.err (!%p576_p2)
}
   0xa   :  { %s580_s10 = scalar_lea.vmem %s32_s25, 512  ;;  %p585_p4 = scmp.lt.s32.totalorder %s32_s25, %s32_s25 }
   0xb   :  { %p581_p3 = scmp.ne.s32.totalorder %s32_s25, %s580_s10  ;;  %p586_p5 = scmp.lt.s32.totalorder %s580_s10, %s580_s10 }
   0xd   :  { %p587_p6 = por %p586_p5, %p585_p4 }
   0xf   :  { %p588_p7 = pnand %p587_p6, %p581_p3 }
  0x11   :  { %591 = shalt.err (!%p588_p7)
}
  0x12   :  { %s689_s11 = smov 128   ;;  %s690_s12 = smov 8  }
  0x13   :  { %37 = dma.hbm_to_vmem [thread:$0]  %s838_s1, 512, %s32_s25, [#allocation6], %s689_s11, %s689_s11, %s690_s12  }
  0x14   :  { %s691_s15 = smov [#allocation2]   ;;  %s692_s17 = smov [#allocation7]  }
  0x15   :  { %s22_s16 = sshll.u32 %s691_s15, 4  ;;  %s45_s18 = sshll.u32 %s692_s17, 4  ;;  %s23_s16 = int_to_ptr.vmem [resolvable:$true] %s22_s16  ;;  %s46_s18 = int_to_ptr.vmem [resolvable:$true] %s45_s18 }
  0x16   :  { %s592_s21 = scalar_lea.hbm %s837_s0, 128 }
  0x17   :  { %p593_p8 = scmp.ne.s32.totalorder %s837_s0, %s592_s21  ;;  %p596_p9 = scmp.lt.u32.totalorder %s592_s21, %s837_s0 }
  0x19   :  { %p598_p10 = pnand %p596_p9, %p593_p8 }
  0x1b   :  { %601 = shalt.err (!%p598_p10)
}
  0x1c   :  { %s602_s1 = scalar_lea.vmem %s23_s16, 128  ;;  %p607_p12 = scmp.lt.s32.totalorder %s23_s16, %s23_s16 }
  0x1d   :  { %p603_p11 = scmp.ne.s32.totalorder %s23_s16, %s602_s1  ;;  %p608_p13 = scmp.lt.s32.totalorder %s602_s1, %s602_s1 }
  0x1f   :  { %p609_p0 = por %p608_p13, %p607_p12 }
  0x21   :  { %p610_p1 = pnand %p609_p0, %p603_p11 }
  0x23   :  { %613 = shalt.err (!%p610_p1)
}
  0x24   :  { %25 = dma.hbm_to_vmem [thread:$0]  %s837_s0, 128, %s23_s16, [#allocation3]  }
  0x25   :  { %s614_s30 = scalar_lea.hbm %s840_s3, 2048 }
  0x26   :  { %p615_p2 = scmp.ne.s32.totalorder %s840_s3, %s614_s30  ;;  %p618_p3 = scmp.lt.u32.totalorder %s614_s30, %s840_s3 }
  0x28   :  { %p620_p4 = pnand %p618_p3, %p615_p2 }
  0x2a   :  { %623 = shalt.err (!%p620_p4)
}
  0x2b   :  { %s624_s14 = scalar_lea.vmem %s46_s18, 2048  ;;  %p629_p6 = scmp.lt.s32.totalorder %s46_s18, %s46_s18 }
  0x2c   :  { %p625_p5 = scmp.ne.s32.totalorder %s46_s18, %s624_s14  ;;  %p630_p7 = scmp.lt.s32.totalorder %s624_s14, %s624_s14 }
  0x2e   :  { %p631_p8 = por %p630_p7, %p629_p6 }
  0x30   :  { %p632_p9 = pnand %p631_p8, %p625_p5 }
  0x32   :  { %635 = shalt.err (!%p632_p9)
}
  0x33   :  { %51 = dma.hbm_to_vmem [thread:$0]  %s840_s3, 2048, %s46_s18, [#allocation6], %s689_s11, %s689_s11, %s690_s12  }
  0x34   :  { %s693_s16 = smov [#allocation8]   ;;  %s636_s21 = scalar_lea.hbm %s842_s5, 2048 }
  0x35   :  { %s59_s17 = sshll.u32 %s693_s16, 4  ;;  %p637_p10 = scmp.ne.s32.totalorder %s842_s5, %s636_s21  ;;  %s60_s17 = int_to_ptr.vmem [resolvable:$true] %s59_s17 }
  0x36   :  { %p640_p11 = scmp.lt.u32.totalorder %s636_s21, %s842_s5 }
  0x38   :  { %p642_p12 = pnand %p640_p11, %p637_p10 }
  0x3a   :  { %645 = shalt.err (!%p642_p12)
}
  0x3b   :  { %s646_s1 = scalar_lea.vmem %s60_s17, 2048  ;;  %p651_p0 = scmp.lt.s32.totalorder %s60_s17, %s60_s17 }
  0x3c   :  { %p647_p13 = scmp.ne.s32.totalorder %s60_s17, %s646_s1  ;;  %p652_p1 = scmp.lt.s32.totalorder %s646_s1, %s646_s1 }
  0x3e   :  { %p653_p2 = por %p652_p1, %p651_p0 }
  0x40   :  { %p654_p3 = pnand %p653_p2, %p647_p13 }
  0x42   :  { %657 = shalt.err (!%p654_p3)
}
  0x43   :  { %65 = dma.hbm_to_vmem [thread:$0]  %s842_s5, 2048, %s60_s17, [#allocation9], %s689_s11, %s689_s11, %s690_s12  }
  0x44   :  { %680 = dma.done.wait [#allocation3], 128  }
  0x45   :  { %681 = vsyncadd [#allocation3], 4294967168 }
  0x46   :  { %682 = dma.done.wait [#allocation6], 2560  }
  0x47   :  { %683 = vsyncadd [#allocation6], 4294964736 }
  0x48   :  { %684 = dma.done.wait [#allocation9], 2048  }
  0x49   :  { %685 = vsyncadd [#allocation9], 4294965248  ;;  %v694_v0 = vmov 0.0|0.0   ;;  %vm695_vm0 = vmmov 0   ;;  %v696_v1 = vmov 0.0   ;;  %v81_v2 = vld [vmem:[#allocation5] sm:$0xff] }
  0x4a   :  { %502 = vmatprep.subr.bf16.mxu0 %v694_v0  ;;  %429 = vmatprep.mubr.msk.f32.mxu0 %vm695_vm0, %v696_v1  ;;  %v82_v3 = vld [vmem:[#allocation5 + $0x8] sm:$0xff]  ;;  %v83_v4 = vld [vmem:[#allocation5 + $0x10] sm:$0xff]  ;;  %v84_v6 = vld [vmem:[#allocation5 + $0x18] sm:$0xff]  ;;  %vm92_vm1 = vcmask 261120   ;;  %s697_s28 = smov [#allocation10]  }
  0x4b   :  { %508 = vmatprep.subr.bf16.mxu1 %v694_v0  ;;  %464 = vmatprep.mubr.msk.f32.mxu1 %vm695_vm0, %v696_v1  ;;  %v503_v5 = vpack.c.bf16 %v82_v3, %v81_v2  ;;  %v167_v7 = vld [vmem:[#allocation7] sm:$0xff]  ;;  %v168_v8 = vld [vmem:[#allocation7 + $0x8] sm:$0xff]  ;;  %v169_v9 = vld [vmem:[#allocation7 + $0x10] sm:$0xff]  ;;  %v506_v11 = vpack.c.bf16 %v84_v6, %v83_v4 }
  0x4c   :  { %v170_v10 = vld [vmem:[#allocation7 + $0x18] sm:$0xff]  ;;  %v509_v12 = vpack.c.bf16 %v168_v8, %v167_v7  ;;  %v171_v14 = vld [vmem:[#allocation7 + $0x20] sm:$0xff]  ;;  %v172_v15 = vld [vmem:[#allocation7 + $0x28] sm:$0xff] }
  0x4d   :  { %504 = vmatpush3.bf16.msra.mxu0 %v503_v5  ;;  %v512_v13 = vpack.c.bf16 %v170_v10, %v169_v9  ;;  %v80_v16 = vld [vmem:[#allocation2] sm:$0xff]  ;;  %v515_v17 = vpack.c.bf16 %v172_v15, %v171_v14  ;;  %v173_v18 = vld [vmem:[#allocation7 + $0x30] sm:$0xff]  ;;  %v175_v21 = vld [vmem:[#allocation7 + $0x40] sm:$0xff] }
  0x4e   :  { %505 = vmatprep.subr.bf16.mxu0 %v694_v0  ;;  %510 = vmatpush3.bf16.msra.mxu1 %v509_v12  ;;  %v174_v19 = vld [vmem:[#allocation7 + $0x38] sm:$0xff]  ;;  %v176_v22 = vld [vmem:[#allocation7 + $0x48] sm:$0xff]  ;;  %v177_v24 = vld [vmem:[#allocation7 + $0x50] sm:$0xff] }
  0x4f   :  { %511 = vmatprep.subr.bf16.mxu1 %v694_v0  ;;  %v518_v20 = vpack.c.bf16 %v174_v19, %v173_v18  ;;  %v521_v23 = vpack.c.bf16 %v176_v22, %v175_v21  ;;  %v178_v25 = vld [vmem:[#allocation7 + $0x58] sm:$0xff]  ;;  %v179_v27 = vld [vmem:[#allocation7 + $0x60] sm:$0xff]  ;;  %v180_v28 = vld [vmem:[#allocation7 + $0x68] sm:$0xff] }
  0x50   :  { %v524_v26 = vpack.c.bf16 %v178_v25, %v177_v24  ;;  %v527_v29 = vpack.c.bf16 %v180_v28, %v179_v27  ;;  %v181_v30 = vld [vmem:[#allocation7 + $0x70] sm:$0xff]  ;;  %v182_v31 = vld [vmem:[#allocation7 + $0x78] sm:$0xff]  ;;  %v261_v33 = vld [vmem:[#allocation8] sm:$0xff] }
  0x51   :  { %507 = vmatpush3.bf16.msra.mxu0 %v506_v11  ;;  %v530_v32 = vpack.c.bf16 %v182_v31, %v181_v30  ;;  %v262_v34 = vld [vmem:[#allocation8 + $0x8] sm:$0xff]  ;;  %v263_v35 = vld [vmem:[#allocation8 + $0x10] sm:$0xff]  ;;  %v264_v37 = vld [vmem:[#allocation8 + $0x18] sm:$0xff] }
  0x52   :  { %532 = vmatprep.subr.bf16.mxu0 %v694_v0  ;;  %513 = vmatpush3.bf16.msra.mxu1 %v512_v13  ;;  %v533_v36 = vpack.c.bf16 %v262_v34, %v261_v33  ;;  %v536_v38 = vpack.c.bf16 %v264_v37, %v263_v35  ;;  %v265_v39 = vld [vmem:[#allocation8 + $0x20] sm:$0xff]  ;;  %v266_v40 = vld [vmem:[#allocation8 + $0x28] sm:$0xff]  ;;  %v267_v42 = vld [vmem:[#allocation8 + $0x30] sm:$0xff] }
  0x53   :  { %514 = vmatprep.subr.bf16.mxu1 %v694_v0  ;;  %v539_v41 = vpack.c.bf16 %v266_v40, %v265_v39  ;;  %v268_v43 = vld [vmem:[#allocation8 + $0x38] sm:$0xff]  ;;  %v269_v45 = vld [vmem:[#allocation8 + $0x40] sm:$0xff]  ;;  %v270_v46 = vld [vmem:[#allocation8 + $0x48] sm:$0xff] }
  0x54   :  { %430 = vmatmul.mubr.msk.f32.vlgmr.msra.gmra.mrb[0].mxu0 %vm92_vm1, %v80_v16  ;;  %v542_v44 = vpack.c.bf16 %v268_v43, %v267_v42  ;;  %v545_v47 = vpack.c.bf16 %v270_v46, %v269_v45  ;;  %v271_v48 = vld [vmem:[#allocation8 + $0x50] sm:$0xff]  ;;  %v272_v49 = vld [vmem:[#allocation8 + $0x58] sm:$0xff]  ;;  %v273_v51 = vld [vmem:[#allocation8 + $0x60] sm:$0xff] }
  0x55   :  { %499 = vmatprep.mubr.msk.f32.mxu0 %vm695_vm0, %v696_v1  ;;  %534 = vmatpush3.bf16.msra.mxu0 %v533_v36  ;;  %v548_v50 = vpack.c.bf16 %v272_v49, %v271_v48  ;;  %v274_v52 = vld [vmem:[#allocation8 + $0x68] sm:$0xff]  ;;  %v378_v54 = vld [vmem:[%s839_s2] ss:$0 sm:$0xff]  ;;  %v275_v59 = vld [vmem:[#allocation8 + $0x70] sm:$0xff] }
  0x56   :  { %516 = vmatpush3.bf16.msra.mxu1 %v515_v17  ;;  %535 = vmatprep.subr.bf16.mxu0 %v694_v0  ;;  %v551_v53 = vpack.c.bf16 %v274_v52, %v273_v51  ;;  %v276_v60 = vld [vmem:[#allocation8 + $0x78] sm:$0xff] }
  0x57   :  { %517 = vmatprep.subr.bf16.mxu1 %v694_v0  ;;  %v554_v61 = vpack.c.bf16 %v276_v60, %v275_v59  ;;  %v380_v62 = vld [vmem:[%s841_s4] ss:$0 sm:$0xff]  ;;  %s367_s4 = sshll.u32 %s697_s28, 4  ;;  %s368_s4 = int_to_ptr.vmem [resolvable:$true] %s367_s4 }
  0x58   :  { %v381_v3 = vld [vmem:[%s843_s6] ss:$0 sm:$0xff]  ;;  %s658_s29 = scalar_lea.vmem %s368_s4, 128  ;;  %p663_p5 = scmp.lt.s32.totalorder %s368_s4, %s368_s4 }
  0x59   :  { %537 = vmatpush3.bf16.msra.mxu0 %v536_v38  ;;  %p659_p4 = scmp.ne.s32.totalorder %s368_s4, %s658_s29  ;;  %p664_p6 = scmp.lt.s32.totalorder %s658_s29, %s658_s29 }
  0x5a   :  { %519 = vmatpush3.bf16.msra.mxu1 %v518_v20  ;;  %538 = vmatprep.subr.bf16.mxu0 %v694_v0 }
  0x5b   :  { %520 = vmatprep.subr.bf16.mxu1 %v694_v0  ;;  %p665_p7 = por %p664_p6, %p663_p5 }
  0x5d   :  { %540 = vmatpush3.bf16.msra.mxu0 %v539_v41  ;;  %p666_p8 = pnand %p665_p7, %p659_p4 }
  0x5e   :  { %522 = vmatpush3.bf16.msra.mxu1 %v521_v23  ;;  %541 = vmatprep.subr.bf16.mxu0 %v694_v0 }
  0x5f   :  { %523 = vmatprep.subr.bf16.mxu1 %v694_v0 }
  0x61   :  { %543 = vmatpush3.bf16.msra.mxu0 %v542_v44 }
  0x62   :  { %525 = vmatpush3.bf16.msra.mxu1 %v524_v26  ;;  %544 = vmatprep.subr.bf16.mxu0 %v694_v0 }
  0x63   :  { %526 = vmatprep.subr.bf16.mxu1 %v694_v0 }
  0x65   :  { %546 = vmatpush3.bf16.msra.mxu0 %v545_v47 }
  0x66   :  { %528 = vmatpush3.bf16.msra.mxu1 %v527_v29  ;;  %547 = vmatprep.subr.bf16.mxu0 %v694_v0 }
  0x67   :  { %529 = vmatprep.subr.bf16.mxu1 %v694_v0 }
  0x69   :  { %549 = vmatpush3.bf16.msra.mxu0 %v548_v50 }
  0x6a   :  { %531 = vmatpush3.bf16.msra.mxu1 %v530_v32  ;;  %550 = vmatprep.subr.bf16.mxu0 %v694_v0 }
  0x6d   :  { %552 = vmatpush3.bf16.msra.mxu0 %v551_v53 }
  0x6e   :  { %553 = vmatprep.subr.bf16.mxu0 %v694_v0 }
  0x71   :  { %555 = vmatpush3.bf16.msra.mxu0 %v554_v61 }
 0x127   :  { %v162_v55 = vpop.f32.mrb[0].mxu0 }
 0x128   :  { %v163_v56 = vadd.f32 %v378_v54, %v162_v55  ;;  %v431_v57 = vpop.f32.mrb[1].mxu0 }
 0x12a   :  { %v166_v58 = vmax.f32 %v163_v56, 0.0 }
 0x12c   :  { %465 = vmatmul.mubr.f32.vlgmr.msra.gmra.mrb[0].mxu1 %v166_v58 }
 0x1ff   :  { %v256_v63 = vpop.f32.mrb[0].mxu1 }
 0x200   :  { %v257_v1 = vadd.f32 %v380_v62, %v256_v63  ;;  %v466_v0 = vpop.f32.mrb[1].mxu1 }
 0x202   :  { %v260_v2 = vmax.f32 %v257_v1, 0.0 }
 0x204   :  { %500 = vmatmul.mubr.f32.vlgmr.msra.gmra.mrb[2].mxu0 %v260_v2 }
 0x2d7   :  { %v350_v4 = vpop.f32.mrb[2].mxu0 }
 0x2d8   :  { %v351_v5 = vadd.f32 %v381_v3, %v350_v4  ;;  %v501_v6 = vpop.f32.mrb[3].mxu0 }
 0x2da   :  { %v354_v7 = vsub.f32 0.0, %v351_v5 }
 0x2dc   :  { %v355_v8 = vmul.f32 1.442695, %v354_v7 }
 0x2de   :  { %566 = vpow2.f32 %v355_v8 }
 0x2e8   :  { %v567_v9 = vpop.eup %566 }
 0x2e9   :  { %v357_v10 = vadd.f32 1.0, %v567_v9 }
 0x2eb   :  { %568 = vrcp.f32 %v357_v10 }
 0x2f5   :  { %v569_v11 = vpop.eup %568 }
 0x2f6   :  { %360 = vst [vmem:[#allocation10] sm:$0xff] %v569_v11 }
 0x2f7   :  { %669 = shalt.err (!%p666_p8)
}
 0x2f8   :  { %s670_s8 = scalar_lea.hbm %s844_s7, 128 }
 0x2f9   :  { %p671_p9 = scmp.ne.s32.totalorder %s844_s7, %s670_s8  ;;  %p674_p10 = scmp.lt.u32.totalorder %s670_s8, %s844_s7 }
 0x2fb   :  { %p676_p11 = pnand %p674_p10, %p671_p9 }
 0x2fd   :  { %679 = shalt.err (!%p676_p11)
}
 0x2fe   :  { %370 = dma.vmem_to_hbm [thread:$0]  %s368_s4, 128, %s844_s7, [#allocation4]  }
 0x2ff   :  { %686 = dma.done.wait [#allocation4], 128  }
 0x300   :  { %687 = vsyncadd [#allocation4], 4294967168 }
 0x301   :  { %374 = vsyncpa [#allocation3], 1 }
 0x302   :  { %375 = vsyncpa [#allocation6], 1 }
 0x303   :  { %376 = vsyncpa [#allocation9], 1 }
 0x304   :  { %377 = vsyncpa [#allocation4], 1 }

</bundles_post_ra>
